<compile_context>
chip_gen: v6e
topology: v6e:2x2x1
jax: 0.10.0
libtpu: 0.0.40
codegen_flags: <defaults>
</compile_context>

<pallas_src>
import functools

import jax
import jax.numpy as jnp
from jax.experimental import pallas as pl
from jax.experimental.pallas import tpu as pltpu

EPS = 1e-05


def _layernorm_kernel(x_ref, scale_ref, shift_ref, o_ref, *, inv_d):
    # x_ref: (TR, D) tile of rows; scale/shift: (1, D) f32 VMEM residents.
    x = x_ref[...].astype(jnp.float32)
    # One-pass statistics; divide by the real D via the static inv_d constant.
    sum_x = jnp.sum(x, axis=-1, keepdims=True)
    sum_xx = jnp.sum(x * x, axis=-1, keepdims=True)
    mean = sum_x * inv_d
    var = sum_xx * inv_d - mean * mean          # population variance (unbiased=False)
    var = jnp.maximum(var, 0.0)                 # guard f32 cancellation going negative
    inv_std = jax.lax.rsqrt(var + EPS)          # EUP slot
    out = (x - mean) * inv_std * scale_ref[...] + shift_ref[...]
    o_ref[...] = out.astype(o_ref.dtype)


def _tpu_profile():
    """Returns (vmem_capacity_bytes, is_v7x_like)."""
    vmem = None
    try:
        info = pltpu.get_tpu_info()
        cap = int(getattr(info, "vmem_capacity_bytes", 0) or 0)
        if cap > 0:
            vmem = cap
    except Exception:
        vmem = None
    kind = ""
    try:
        kind = jax.devices()[0].device_kind.lower()
    except Exception:
        pass
    is_v7 = "v7" in kind
    if vmem is None:
        vmem = (64 << 20) if is_v7 else (128 << 20)
    if vmem <= (64 << 20):
        is_v7 = True
    return vmem, is_v7


def _choose_tile_rows(R, D, in_itemsize, out_itemsize, vmem_bytes, is_v7x):
    """Pick a large row tile that fits comfortably in (double-buffered) VMEM."""
    sub = 8 if min(in_itemsize, out_itemsize) >= 4 else 16
    # Per-row VMEM cost: double-buffered input + output tiles plus ~3 f32-wide
    # intermediates live inside the kernel body (x_f32, pre-cast output, temps).
    per_row = D * (2 * in_itemsize + 2 * out_itemsize + 3 * 4)
    budget_frac = 0.35 if is_v7x else 0.45
    budget = int(vmem_bytes * budget_frac)
    tr = budget // max(per_row, 1)
    tr = max(sub, min(1024, (tr // sub) * sub))
    # Never exceed the (sublane-rounded) total row count.
    r_ceil = ((R + sub - 1) // sub) * sub
    tr = min(tr, r_ceil)
    if is_v7x and R >= 8 * sub:
        # Target >= 8 grid steps so the 2-TensorCore sharding of the "parallel"
        # axis stays balanced; per-step overhead is negligible at these sizes.
        cap = max(sub, ((R // 8) // sub) * sub)
        tr = min(tr, cap)
    return tr


def layer_normalization(x, scale, shift):
    """x: (..., D); scale, shift: (D,). Returns same shape/dtype as x."""
    orig_shape = x.shape
    orig_dtype = x.dtype
    D = orig_shape[-1]
    R = 1
    for s in orig_shape[:-1]:
        R *= s
    x2 = x.reshape(R, D)

    # scale/shift pre-cast to f32 once; kept whole in VMEM (no per-step DMA).
    scale_f32 = scale.astype(jnp.float32).reshape(1, D)
    shift_f32 = shift.astype(jnp.float32).reshape(1, D)

    vmem_bytes, is_v7x = _tpu_profile()
    in_itemsize = jnp.dtype(x2.dtype).itemsize
    out_itemsize = jnp.dtype(orig_dtype).itemsize
    tr = _choose_tile_rows(R, D, in_itemsize, out_itemsize, vmem_bytes, is_v7x)

    # No row padding: Pallas masks the stores of the partial last block, and
    # garbage rows read into that block cannot affect valid rows (row-wise op).
    grid = (pl.cdiv(R, tr),)

    if is_v7x:
        vmem_limit = min(int(vmem_bytes * 5 // 8), 40 << 20)   # ~40 MiB on 64 MiB chips
    else:
        vmem_limit = min(int(vmem_bytes * 0.55), 72 << 20)     # headroom on 128 MiB chips

    kernel = functools.partial(_layernorm_kernel, inv_d=1.0 / D)

    out = pl.pallas_call(
        kernel,
        out_shape=jax.ShapeDtypeStruct((R, D), orig_dtype),
        grid_spec=pltpu.PrefetchScalarGridSpec(
            num_scalar_prefetch=0,
            grid=grid,
            in_specs=[
                pl.BlockSpec((tr, D), lambda i: (i, 0)),
                pl.BlockSpec(memory_space=pltpu.MemorySpace.VMEM),
                pl.BlockSpec(memory_space=pltpu.MemorySpace.VMEM),
            ],
            out_specs=pl.BlockSpec((tr, D), lambda i: (i, 0)),
        ),
        compiler_params=pltpu.CompilerParams(
            dimension_semantics=("parallel",),
            vmem_limit_bytes=vmem_limit,
        ),
        cost_estimate=pl.CostEstimate(
            flops=8 * R * D,
            transcendentals=R,
            bytes_accessed=R * D * (in_itemsize + out_itemsize) + 2 * D * 4,
        ),
    )(x2, scale_f32, shift_f32)

    return out.reshape(orig_shape)


if __name__ == "__main__":
    key = jax.random.PRNGKey(0)
    batch, seq, emb_dim = 2, 8, 32
    x = jax.random.normal(key, (batch, seq, emb_dim), dtype=jnp.float32)

    # Deterministic parameters matching nn.Parameter(torch.ones/zeros(emb_dim)).
    scale = jnp.ones((emb_dim,), dtype=jnp.float32)
    shift = jnp.zeros((emb_dim,), dtype=jnp.float32)

    out = layer_normalization(x, scale, shift)
    out = jax.block_until_ready(out)

    # Reference check (plain JAX, two-pass) for sanity.
    mean = jnp.mean(x, axis=-1, keepdims=True)
    var = jnp.mean((x - mean) ** 2, axis=-1, keepdims=True)
    ref = scale * ((x - mean) / jnp.sqrt(var + EPS)) + shift
    assert out.shape == x.shape and out.dtype == x.dtype
    assert jnp.allclose(out, ref, atol=1e-5, rtol=1e-5), "mismatch vs reference"

    print("KERNEL_OK")
</pallas_src>

<mosaic_0001>
module attributes {stable_mosaic.version = 11 : i64} {
  func.func @_layernorm_kernel(%arg0: i32, %arg1: memref<16x32xf32, #tpu.memory_space<vmem>>, %arg2: memref<1x32xf32, #tpu.memory_space<vmem>>, %arg3: memref<1x32xf32, #tpu.memory_space<vmem>>, %arg4: memref<16x32xf32, #tpu.memory_space<vmem>>) attributes {dimension_semantics = [#tpu.dimension_semantics<parallel>], iteration_bounds = array<i64: 1>, scalar_prefetch = 0 : i64, scratch_operands = 0 : i64, tpu.core_type = #tpu.core_type<tc>, window_params = [{transform_indices = @transform_0, window_bounds = array<i64: 16, 32>}, {pipeline_mode = #tpu.pipeline_mode<synchronous>, transform_indices = @transform_1, window_bounds = array<i64: 1, 32>}, {pipeline_mode = #tpu.pipeline_mode<synchronous>, transform_indices = @transform_2, window_bounds = array<i64: 1, 32>}, {transform_indices = @transform_3, window_bounds = array<i64: 16, 32>}]} {
    %c0 = arith.constant 0 : index
    %c0_0 = arith.constant 0 : index
    %0 = vector.load %arg1[%c0, %c0_0] : memref<16x32xf32, #tpu.memory_space<vmem>>, vector<16x32xf32>
    %cst = arith.constant dense<0.000000e+00> : vector<16xf32>
    %1 = vector.multi_reduction <add>, %0, %cst [1] : vector<16x32xf32> to vector<16xf32>
    %2 = vector.shape_cast %1 : vector<16xf32> to vector<16x1xf32>
    %3 = arith.mulf %0, %0 : vector<16x32xf32>
    %cst_1 = arith.constant dense<0.000000e+00> : vector<16xf32>
    %4 = vector.multi_reduction <add>, %3, %cst_1 [1] : vector<16x32xf32> to vector<16xf32>
    %5 = vector.shape_cast %4 : vector<16xf32> to vector<16x1xf32>
    %cst_2 = arith.constant 3.125000e-02 : f32
    %6 = vector.broadcast %cst_2 : f32 to vector<16x1xf32>
    %7 = arith.mulf %2, %6 : vector<16x1xf32>
    %cst_3 = arith.constant 3.125000e-02 : f32
    %8 = vector.broadcast %cst_3 : f32 to vector<16x1xf32>
    %9 = arith.mulf %5, %8 : vector<16x1xf32>
    %10 = arith.mulf %7, %7 : vector<16x1xf32>
    %11 = arith.subf %9, %10 : vector<16x1xf32>
    %cst_4 = arith.constant 0.000000e+00 : f32
    %12 = vector.broadcast %cst_4 : f32 to vector<16x1xf32>
    %13 = arith.maximumf %11, %12 : vector<16x1xf32>
    %cst_5 = arith.constant 9.99999974E-6 : f32
    %14 = vector.broadcast %cst_5 : f32 to vector<16x1xf32>
    %15 = arith.addf %13, %14 : vector<16x1xf32>
    %16 = math.rsqrt %15 : vector<16x1xf32>
    %17 = vector.broadcast %7 : vector<16x1xf32> to vector<16x32xf32>
    %18 = arith.subf %0, %17 : vector<16x32xf32>
    %19 = vector.broadcast %16 : vector<16x1xf32> to vector<16x32xf32>
    %20 = arith.mulf %18, %19 : vector<16x32xf32>
    %c0_6 = arith.constant 0 : index
    %c0_7 = arith.constant 0 : index
    %21 = vector.load %arg2[%c0_6, %c0_7] : memref<1x32xf32, #tpu.memory_space<vmem>>, vector<1x32xf32>
    %22 = vector.broadcast %21 : vector<1x32xf32> to vector<16x32xf32>
    %23 = arith.mulf %20, %22 : vector<16x32xf32>
    %c0_8 = arith.constant 0 : index
    %c0_9 = arith.constant 0 : index
    %24 = vector.load %arg3[%c0_8, %c0_9] : memref<1x32xf32, #tpu.memory_space<vmem>>, vector<1x32xf32>
    %25 = vector.broadcast %24 : vector<1x32xf32> to vector<16x32xf32>
    %26 = arith.addf %23, %25 : vector<16x32xf32>
    %c0_10 = arith.constant 0 : index
    %c0_11 = arith.constant 0 : index
    %27 = vector.load %arg4[%c0_10, %c0_11] : memref<16x32xf32, #tpu.memory_space<vmem>>, vector<16x32xf32>
    tpu.vector_store %arg4[%c0_10, %c0_11], %26 {strides = array<i32>} : memref<16x32xf32, #tpu.memory_space<vmem>>, vector<16x32xf32>,
    return
  }
  func.func @transform_0(%arg0: i32) -> (i32, i32) {
    %c0_i32 = arith.constant 0 : i32
    %c0_i32_0 = arith.constant 0 : i32
    return %arg0, %c0_i32 : i32, i32
  }
  func.func @transform_1(%arg0: i32) -> (i32, i32) {
    %c0_i32 = arith.constant 0 : i32
    %c0_i32_0 = arith.constant 0 : i32
    %c0_i32_1 = arith.constant 0 : i32
    return %c0_i32, %c0_i32_0 : i32, i32
  }
  func.func @transform_2(%arg0: i32) -> (i32, i32) {
    %c0_i32 = arith.constant 0 : i32
    %c0_i32_0 = arith.constant 0 : i32
    %c0_i32_1 = arith.constant 0 : i32
    return %c0_i32, %c0_i32_0 : i32, i32
  }
  func.func @transform_3(%arg0: i32) -> (i32, i32) {
    %c0_i32 = arith.constant 0 : i32
    %c0_i32_0 = arith.constant 0 : i32
    return %arg0, %c0_i32 : i32, i32
  }
}

</mosaic_0001>

<bundles_post_ra>
// kernel: tpu_custom_call.1
= control target key start
LH: loop header
LB: loop body
LE: loop exit
PB: predicated region body
PF: predicated region fallthrough
CT: control target
= control target key end

     0   :  { %8 = vsyncpa [#allocation3], 0  ;;  %s203_s0 = inlined_call_operand.hbm [shape: f32[16,32], index: 0, kind: input, shape index: {}]   ;;  %s204_s1 = inlined_call_operand.vmem [shape: f32[1,32], index: 1, kind: input, shape index: {}]   ;;  %s205_s2 = inlined_call_operand.vmem [shape: f32[1,32], index: 2, kind: input, shape index: {}]   ;;  %s206_s3 = inlined_call_operand.hbm [shape: f32[16,32], index: 3, kind: output, shape index: {}]  }
   0x1   :  { %9 = vsyncpa [#allocation4], 0  ;;  %s155_s12 = smov [#allocation2]  }
   0x2   :  { %s15_s13 = sshll.u32 %s155_s12, 4  ;;  %s16_s13 = int_to_ptr.vmem [resolvable:$true] %s15_s13 }
   0x3   :  { %s119_s14 = scalar_lea.vmem %s16_s13, 256  ;;  %p124_p1 = scmp.lt.s32.totalorder %s16_s13, %s16_s13 }
   0x4   :  { %p120_p0 = scmp.ne.s32.totalorder %s16_s13, %s119_s14  ;;  %p125_p2 = scmp.lt.s32.totalorder %s119_s14, %s119_s14 }
   0x6   :  { %p126_p3 = por %p125_p2, %p124_p1 }
   0x8   :  { %p127_p4 = pnand %p126_p3, %p120_p0 }
   0xa   :  { %130 = shalt.err (!%p127_p4)
}
   0xb   :  { %s156_s15 = smov 128   ;;  %s157_s16 = smov 8  }
   0xc   :  { %21 = dma.hbm_to_vmem [thread:$0]  %s203_s0, 256, %s16_s13, [#allocation3], %s156_s15, %s156_s15, %s157_s16  }
   0xd   :  { %151 = dma.done.wait [#allocation3], 256  }
   0xe   :  { %152 = vsyncadd [#allocation3], 4294967040  ;;  %vm31_vm0 = vcmask 261120   ;;  %v29_v0 = vld [vmem:[#allocation2] sm:$0xff]  ;;  %v30_v1 = vld [vmem:[#allocation2 + $0x8] sm:$0xff]  ;;  %s158_s22 = smov [#allocation5]  }
   0xf   :  { %v32_v2 = vsel %vm31_vm0, %v29_v0, 0.0  ;;  %v38_v3 = vmul.f32 %v29_v0, %v29_v0  ;;  %v39_v4 = vmul.f32 %v30_v1, %v30_v1  ;;  %v35_v6 = vsel %vm31_vm0, %v30_v1, 0.0  ;;  %v101_v26 = vld [vmem:[%s204_s1] ss:$0 sm:$0xff]  ;;  %s89_s23 = sshll.u32 %s158_s22, 4  ;;  %s90_s23 = int_to_ptr.vmem [resolvable:$true] %s89_s23 }
  0x10   :  { %33 = vadd.xlane.f32.xlu0 %v32_v2  ;;  %v102_v28 = vld [vmem:[%s205_s2] ss:$0 sm:$0xff]  ;;  %s131_s1 = scalar_lea.vmem %s90_s23, 256  ;;  %p136_p6 = scmp.lt.s32.totalorder %s90_s23, %s90_s23 }
  0x11   :  { %v40_v5 = vsel %vm31_vm0, %v38_v3, 0.0  ;;  %v43_v7 = vsel %vm31_vm0, %v39_v4, 0.0  ;;  %p132_p5 = scmp.ne.s32.totalorder %s90_s23, %s131_s1  ;;  %p137_p7 = scmp.lt.s32.totalorder %s131_s1, %s131_s1 }
  0x12   :  { %41 = vadd.xlane.f32.xlu1 %v40_v5 }
  0x13   :  { %p138_p8 = por %p137_p7, %p136_p6 }
  0x14   :  { %36 = vadd.xlane.f32.xlu0 %v35_v6 }
  0x15   :  { %p139_p9 = pnand %p138_p8, %p132_p5 }
  0x16   :  { %44 = vadd.xlane.f32.xlu1 %v43_v7 }
  0x99   :  { %v34_v8 = vpop.xlane.xlu0 %33 }
  0x9a   :  { %v46_v9 = vmul.f32 0.03125, %v34_v8 }
  0x9b   :  { %v42_v10 = vpop.xlane.xlu1 %41 }
  0x9c   :  { %v50_v11 = vmul.f32 %v46_v9, %v46_v9  ;;  %v48_v12 = vmul.f32 0.03125, %v42_v10  ;;  %v60_v24 = vsub.f32 %v29_v0, %v46_v9 }
  0x9d   :  { %v37_v13 = vpop.xlane.xlu0 %36 }
  0x9e   :  { %v52_v14 = vsub.f32 %v48_v12, %v50_v11  ;;  %v47_v15 = vmul.f32 0.03125, %v37_v13 }
  0x9f   :  { %v45_v16 = vpop.xlane.xlu1 %44 }
  0xa0   :  { %v54_v17 = vmax.f32 %v52_v14, 0.0  ;;  %v51_v18 = vmul.f32 %v47_v15, %v47_v15  ;;  %v49_v19 = vmul.f32 0.03125, %v45_v16  ;;  %v61_v29 = vsub.f32 %v30_v1, %v47_v15 }
  0xa2   :  { %v56_v20 = vadd.f32 1e-05, %v54_v17  ;;  %v53_v21 = vsub.f32 %v49_v19, %v51_v18 }
  0xa4   :  { %107 = vrsqrt.f32 %v56_v20  ;;  %v55_v22 = vmax.f32 %v53_v21, 0.0 }
  0xa6   :  { %v57_v23 = vadd.f32 1e-05, %v55_v22 }
  0xa8   :  { %109 = vrsqrt.f32 %v57_v23 }
  0xb1   :  { %v108_v25 = vpop.eup %107 }
  0xb2   :  { %v62_v27 = vmul.f32 %v108_v25, %v60_v24 }
  0xb4   :  { %v71_v30 = vmul.f32 %v101_v26, %v62_v27 }
  0xb5   :  { %v110_v31 = vpop.eup %109 }
  0xb6   :  { %v63_v32 = vmul.f32 %v110_v31, %v61_v29  ;;  %v80_v33 = vadd.f32 %v102_v28, %v71_v30 }
  0xb8   :  { %v72_v34 = vmul.f32 %v101_v26, %v63_v32  ;;  %82 = vst.msk [vmem:[#allocation5] sm:$0xff] %vm31_vm0, %v80_v33 }
  0xba   :  { %v81_v35 = vadd.f32 %v102_v28, %v72_v34 }
  0xbc   :  { %83 = vst.msk [vmem:[#allocation5 + $0x8] sm:$0xff] %vm31_vm0, %v81_v35 }
  0xbd   :  { %142 = shalt.err (!%p139_p9)
}
  0xbe   :  { %95 = dma.vmem_to_hbm [thread:$0]  %s90_s23, 256, %s206_s3, [#allocation4], %s156_s15, %s156_s15, %s157_s16  }
  0xbf   :  { %153 = dma.done.wait [#allocation4], 256  }
  0xc0   :  { %154 = vsyncadd [#allocation4], 4294967040 }
  0xc1   :  { %99 = vsyncpa [#allocation3], 1 }
  0xc2   :  { %100 = vsyncpa [#allocation4], 1 }

</bundles_post_ra>
